<compile_context>
chip_gen: v7x
topology: tpu7x:2x2x1
jax: 0.10.0
libtpu: 0.0.40
codegen_flags: <defaults>
</compile_context>

<pallas_src>
import functools

import jax
import jax.numpy as jnp
import numpy as np
from jax.experimental import pallas as pl
from jax.experimental.pallas import tpu as pltpu


_MEL_TILE_ROWS = 2048  # rows (frames) per grid step for the fused mel kernel


# ----------------------------------------------------------------------------
# Kernel 1: fused masked-L1 partial sums for mel + postnet-mel predictions.
#   out_ref (SMEM, resident across the grid):
#     [0] += sum(|mel_pred     - tgt| * w)
#     [1] += sum(|postnet_pred - tgt| * w)
#     [2] += sum(w)        (w is the (TILE, 1) frame-validity column)
# ----------------------------------------------------------------------------
def _mel_l1_kernel(p1_ref, p2_ref, tgt_ref, w_ref, out_ref):
    i = pl.program_id(0)

    @pl.when(i == 0)
    def _init():
        out_ref[0] = jnp.float32(0.0)
        out_ref[1] = jnp.float32(0.0)
        out_ref[2] = jnp.float32(0.0)

    t = tgt_ref[...]
    w = w_ref[...]                      # (TILE, 1) -> lane-broadcast in the muls
    out_ref[0] = out_ref[0] + jnp.sum(jnp.abs(p1_ref[...] - t) * w)
    out_ref[1] = out_ref[1] + jnp.sum(jnp.abs(p2_ref[...] - t) * w)
    out_ref[2] = out_ref[2] + jnp.sum(w)


def _fused_mel_l1(mel_pred, postnet_pred, mel_tgt, mel_valid):
    """Masked-mean L1 for mel and postnet-mel predictions (shared target/mask)."""
    B, T, M = mel_tgt.shape
    rows = B * T
    p1 = mel_pred.reshape(rows, M)
    p2 = postnet_pred.reshape(rows, M)
    tgt = mel_tgt.reshape(rows, M)
    w = mel_valid.reshape(rows, 1)

    tile = _MEL_TILE_ROWS
    if rows < tile:
        tile = ((rows + 7) // 8) * 8            # multiple of 8 (sublane rule)
    rows_pad = ((rows + tile - 1) // tile) * tile
    if rows_pad != rows:
        pad = rows_pad - rows
        p1 = jnp.pad(p1, ((0, pad), (0, 0)))
        p2 = jnp.pad(p2, ((0, pad), (0, 0)))
        tgt = jnp.pad(tgt, ((0, pad), (0, 0)))
        w = jnp.pad(w, ((0, pad), (0, 0)))      # zero weight -> no contribution

    data_spec = pl.BlockSpec((tile, M), lambda i: (i, 0))
    w_spec = pl.BlockSpec((tile, 1), lambda i: (i, 0))

    sums = pl.pallas_call(
        _mel_l1_kernel,
        out_shape=jax.ShapeDtypeStruct((3,), jnp.float32),
        grid=(rows_pad // tile,),
        in_specs=[data_spec, data_spec, data_spec, w_spec],
        out_specs=pl.BlockSpec((3,), lambda i: (0,),
                               memory_space=pltpu.MemorySpace.SMEM),
        compiler_params=pltpu.CompilerParams(
            dimension_semantics=("arbitrary",)),
    )(p1, p2, tgt, w)

    denom = sums[2] * jnp.float32(M)   # = number of selected mel elements
    return sums[0] / denom, sums[1] / denom


# ----------------------------------------------------------------------------
# Kernel 2: fused tiny losses (pitch / energy / duration masked-MSE partial
# sums + unmasked prosody-embedding squared error), one launch, 7 scalars out.
# ----------------------------------------------------------------------------
def _small_losses_kernel(pp_ref, pt_ref, pw_ref,
                         ep_ref, et_ref, ew_ref,
                         dp_ref, dt_ref, dw_ref,
                         rp_ref, rt_ref, out_ref):
    def masked_sq(p_ref, t_ref, w_ref):
        d = p_ref[...] - t_ref[...]
        w = w_ref[...]
        return jnp.sum(d * d * w), jnp.sum(w)

    s, c = masked_sq(pp_ref, pt_ref, pw_ref)      # pitch (MSE)
    out_ref[0] = s
    out_ref[1] = c
    s, c = masked_sq(ep_ref, et_ref, ew_ref)      # energy (MSE)
    out_ref[2] = s
    out_ref[3] = c
    s, c = masked_sq(dp_ref, dt_ref, dw_ref)      # log-duration (MSE)
    out_ref[4] = s
    out_ref[5] = c
    d = rp_ref[...] - rt_ref[...]                 # prosody embedding (MSE, no mask)
    out_ref[6] = jnp.sum(d * d)


def _fused_small_losses(pp, pt, pw, ep, et, ew, dp, dt, dw, rp, rt):
    vmem = pl.BlockSpec(memory_space=pltpu.MemorySpace.VMEM)
    return pl.pallas_call(
        _small_losses_kernel,
        out_shape=jax.ShapeDtypeStruct((7,), jnp.float32),
        in_specs=[vmem] * 11,
        out_specs=pl.BlockSpec(memory_space=pltpu.MemorySpace.SMEM),
    )(pp, pt, pw, ep, et, ew, dp, dt, dw, rp, rt)


# ----------------------------------------------------------------------------
# Jitted end-to-end loss computation (no host syncs inside).
# ----------------------------------------------------------------------------
def _compute_losses(mel_targets, pitch_targets, energy_targets, duration_targets,
                    mel_predictions, postnet_mel_predictions, pitch_predictions,
                    energy_predictions, log_duration_predictions,
                    src_masks, mel_masks, predicted_prosody_embs, prosody_target,
                    *, pitch_phoneme, energy_phoneme, beta):
    f32 = jnp.float32
    src_valid = jnp.logical_not(src_masks).astype(f32)     # (B, T_src)
    mel_valid = jnp.logical_not(mel_masks).astype(f32)     # (B, T_mel)
    log_duration_targets = jnp.log(duration_targets.astype(f32) + 1.0)
    mel_targets = mel_targets[:, : mel_masks.shape[1], :].astype(f32)

    # --- fused mel + postnet masked L1 (shared target / mask stream) ---------
    mel_loss, postnet_mel_loss = _fused_mel_l1(
        mel_predictions.astype(f32),
        postnet_mel_predictions.astype(f32),
        mel_targets,
        mel_valid,
    )

    # --- fused small masked MSE losses ---------------------------------------
    w_pitch = src_valid if pitch_phoneme else mel_valid
    w_energy = src_valid if energy_phoneme else mel_valid

    sums = _fused_small_losses(
        pitch_predictions.astype(f32), pitch_targets.astype(f32), w_pitch,
        energy_predictions.astype(f32), energy_targets.astype(f32), w_energy,
        log_duration_predictions.astype(f32), log_duration_targets, src_valid,
        predicted_prosody_embs.astype(f32), prosody_target.astype(f32),
    )

    pitch_loss = sums[0] / sums[1]
    energy_loss = sums[2] / sums[3]
    duration_loss = sums[4] / sums[5]
    prosody_emb_loss = sums[6] / f32(predicted_prosody_embs.size)  # static count

    total_loss = (mel_loss + postnet_mel_loss + duration_loss + pitch_loss
                  + energy_loss + beta * prosody_emb_loss)
    return jnp.stack([total_loss, mel_loss, postnet_mel_loss, pitch_loss,
                      energy_loss, duration_loss, prosody_emb_loss])


# ----------------------------------------------------------------------------
# Loss module (JAX / Pallas re-implementation of the PyTorch nn.Module).
# ----------------------------------------------------------------------------
class FastSpeech2wContextswPEProsodywCurrentMelsLoss:
    def __init__(self, pitch_feature_level, energy_feature_level, beta):
        self.pitch_feature_level = (
            "phoneme_level" if pitch_feature_level > 0 else "frame_level")
        self.energy_feature_level = (
            "phoneme_level" if energy_feature_level > 0 else "frame_level")
        self.beta = float(beta)
        self._compute = jax.jit(functools.partial(
            _compute_losses,
            pitch_phoneme=(self.pitch_feature_level == "phoneme_level"),
            energy_phoneme=(self.energy_feature_level == "phoneme_level"),
            beta=self.beta,
        ))

    def __call__(self, inputs, predictions):
        (target_prosody_embs, _, _, _, _, _, _, _, _, _, _,
         mel_targets, _, _, pitch_targets, energy_targets,
         duration_targets) = inputs[-17:]
        (mel_predictions, postnet_mel_predictions, pitch_predictions,
         energy_predictions, log_duration_predictions, _, src_masks,
         mel_masks, _, _, predicted_prosody_embs,
         current_prosody_prediction) = predictions[:12]

        prosody_target = (target_prosody_embs
                          if current_prosody_prediction is None
                          else current_prosody_prediction)

        stacked = self._compute(
            mel_targets, pitch_targets, energy_targets, duration_targets,
            mel_predictions, postnet_mel_predictions, pitch_predictions,
            energy_predictions, log_duration_predictions, src_masks,
            mel_masks, predicted_prosody_embs, prosody_target)

        total_loss = stacked[0]
        vals = jax.device_get(stacked)          # single device -> host sync
        loss_values = {
            "prosody_emb_loss": float(vals[6]),
            "mel_loss": float(vals[1]),
            "postnet_mel_loss": float(vals[2]),
            "pitch_loss": float(vals[3]),
            "energy_loss": float(vals[4]),
            "duration_loss": float(vals[5]),
            "total_loss": float(vals[0]),
        }
        return total_loss, loss_values


# ----------------------------------------------------------------------------
# Pure-numpy reference (mirrors torch masked_select + mean semantics).
# ----------------------------------------------------------------------------
def _ref_masked_mean(pred, tgt, mask, loss_type):
    pred = np.asarray(pred, np.float64)
    tgt = np.asarray(tgt, np.float64)
    mask = np.asarray(mask, bool)
    d = pred[mask] - tgt[mask]
    return float(np.mean(np.abs(d)) if loss_type == "l1" else np.mean(d * d))


if __name__ == "__main__":
    key = jax.random.PRNGKey(0)
    B, T_src, T_mel, n_mels, d_pros = 2, 8, 16, 8, 32

    ks = jax.random.split(key, 12)
    mel_targets = jax.random.normal(ks[0], (B, T_mel, n_mels), jnp.float32)
    mel_predictions = jax.random.normal(ks[1], (B, T_mel, n_mels), jnp.float32)
    postnet_mel_predictions = jax.random.normal(ks[2], (B, T_mel, n_mels), jnp.float32)
    pitch_targets = jax.random.normal(ks[3], (B, T_src), jnp.float32)       # phoneme level
    pitch_predictions = jax.random.normal(ks[4], (B, T_src), jnp.float32)
    energy_targets = jax.random.normal(ks[5], (B, T_mel), jnp.float32)      # frame level
    energy_predictions = jax.random.normal(ks[6], (B, T_mel), jnp.float32)
    duration_targets = jax.random.randint(ks[7], (B, T_src), 1, 6).astype(jnp.int32)
    log_duration_predictions = jax.random.normal(ks[8], (B, T_src), jnp.float32)
    target_prosody_embs = jax.random.normal(ks[9], (B, d_pros), jnp.float32)
    predicted_prosody_embs = jax.random.normal(ks[10], (B, d_pros), jnp.float32)
    current_prosody_prediction = jax.random.normal(ks[11], (B, d_pros), jnp.float32)

    # padding masks: True == padded (as in FastSpeech2)
    src_lens = jnp.array([8, 5])
    mel_lens = jnp.array([16, 11])
    src_masks = jnp.arange(T_src)[None, :] >= src_lens[:, None]   # (B, T_src) bool
    mel_masks = jnp.arange(T_mel)[None, :] >= mel_lens[:, None]   # (B, T_mel) bool

    inputs = (
        target_prosody_embs, None, None, None, None, None, None, None, None,
        None, None, mel_targets, None, None, pitch_targets, energy_targets,
        duration_targets,
    )
    predictions = (
        mel_predictions, postnet_mel_predictions, pitch_predictions,
        energy_predictions, log_duration_predictions, None, src_masks,
        mel_masks, None, None, predicted_prosody_embs,
        current_prosody_prediction,
    )

    # pitch: phoneme level, energy: frame level
    loss_fn = FastSpeech2wContextswPEProsodywCurrentMelsLoss(
        pitch_feature_level=1, energy_feature_level=0, beta=0.5
    )
    total_loss, loss_values = loss_fn(inputs, predictions)
    jax.block_until_ready(total_loss)

    # ---- reference check -----------------------------------------------------
    src_v = ~np.asarray(src_masks)
    mel_v = ~np.asarray(mel_masks)
    mel_v3 = np.broadcast_to(mel_v[..., None], mel_targets.shape)
    ref = {
        "mel_loss": _ref_masked_mean(mel_predictions, mel_targets, mel_v3, "l1"),
        "postnet_mel_loss": _ref_masked_mean(
            postnet_mel_predictions, mel_targets, mel_v3, "l1"),
        "pitch_loss": _ref_masked_mean(pitch_predictions, pitch_targets, src_v, "l2"),
        "energy_loss": _ref_masked_mean(energy_predictions, energy_targets, mel_v, "l2"),
        "duration_loss": _ref_masked_mean(
            log_duration_predictions,
            np.log(np.asarray(duration_targets, np.float64) + 1.0),
            src_v, "l2"),
        "prosody_emb_loss": _ref_masked_mean(
            predicted_prosody_embs, current_prosody_prediction,
            np.ones(np.asarray(predicted_prosody_embs).shape, bool), "l2"),
    }
    ref["total_loss"] = (
        ref["mel_loss"] + ref["postnet_mel_loss"] + ref["duration_loss"]
        + ref["pitch_loss"] + ref["energy_loss"] + 0.5 * ref["prosody_emb_loss"]
    )
    for name, rv in ref.items():
        np.testing.assert_allclose(loss_values[name], rv, rtol=1e-4, atol=1e-5)

    print("KERNEL_OK")
</pallas_src>

<mosaic_0001>
module attributes {stable_mosaic.version = 11 : i64} {
  func.func @_mel_l1_kernel(%arg0: i32, %arg1: memref<32x8xf32, #tpu.memory_space<vmem>>, %arg2: memref<32x8xf32, #tpu.memory_space<vmem>>, %arg3: memref<32x8xf32, #tpu.memory_space<vmem>>, %arg4: memref<32x1xf32, #tpu.memory_space<vmem>>, %arg5: memref<3xf32, #tpu.memory_space<smem>>) attributes {dimension_semantics = [#tpu.dimension_semantics<arbitrary>], iteration_bounds = array<i64: 1>, scalar_prefetch = 0 : i64, scratch_operands = 0 : i64, tpu.core_type = #tpu.core_type<tc>, window_params = [{transform_indices = @transform_0, window_bounds = array<i64: 32, 8>}, {transform_indices = @transform_1, window_bounds = array<i64: 32, 8>}, {transform_indices = @transform_2, window_bounds = array<i64: 32, 8>}, {transform_indices = @transform_3, window_bounds = array<i64: 32, 1>}, {transform_indices = @transform_4, window_bounds = array<i64: 3>}]} {
    %c0_i32 = arith.constant 0 : i32
    %0 = arith.cmpi eq, %arg0, %c0_i32 : i32
    %1 = arith.extui %0 : i1 to i32
    %c0_i32_0 = arith.constant 0 : i32
    %2 = arith.cmpi ne, %1, %c0_i32_0 : i32
    scf.if %2 {
      %cst_14 = arith.constant 0.000000e+00 : f32
      %c0_15 = arith.constant 0 : index
      %36 = memref.load %arg5[%c0_15] : memref<3xf32, #tpu.memory_space<smem>>
      memref.store %cst_14, %arg5[%c0_15] : memref<3xf32, #tpu.memory_space<smem>>
      %cst_16 = arith.constant 0.000000e+00 : f32
      %c1_17 = arith.constant 1 : index
      %37 = memref.load %arg5[%c1_17] : memref<3xf32, #tpu.memory_space<smem>>
      memref.store %cst_16, %arg5[%c1_17] : memref<3xf32, #tpu.memory_space<smem>>
      %cst_18 = arith.constant 0.000000e+00 : f32
      %c2_19 = arith.constant 2 : index
      %38 = memref.load %arg5[%c2_19] : memref<3xf32, #tpu.memory_space<smem>>
      memref.store %cst_18, %arg5[%c2_19] : memref<3xf32, #tpu.memory_space<smem>>
    } else {
    }
    %c0 = arith.constant 0 : index
    %c0_1 = arith.constant 0 : index
    %3 = vector.load %arg3[%c0, %c0_1] : memref<32x8xf32, #tpu.memory_space<vmem>>, vector<32x8xf32>
    %c0_2 = arith.constant 0 : index
    %c0_3 = arith.constant 0 : index
    %4 = vector.load %arg4[%c0_2, %c0_3] : memref<32x1xf32, #tpu.memory_space<vmem>>, vector<32x1xf32>
    %c0_4 = arith.constant 0 : index
    %5 = memref.load %arg5[%c0_4] : memref<3xf32, #tpu.memory_space<smem>>
    %c0_5 = arith.constant 0 : index
    %c0_6 = arith.constant 0 : index
    %6 = vector.load %arg1[%c0_5, %c0_6] : memref<32x8xf32, #tpu.memory_space<vmem>>, vector<32x8xf32>
    %7 = arith.subf %6, %3 : vector<32x8xf32>
    %8 = math.absf %7 : vector<32x8xf32>
    %9 = vector.broadcast %4 : vector<32x1xf32> to vector<32x8xf32>
    %10 = arith.mulf %8, %9 : vector<32x8xf32>
    %11 = vector.shape_cast %10 : vector<32x8xf32> to vector<1x32x8xf32>
    %cst = arith.constant dense<0.000000e+00> : vector<1xf32>
    %12 = vector.multi_reduction <add>, %11, %cst [1, 2] : vector<1x32x8xf32> to vector<1xf32>
    %13 = vector.shape_cast %12 : vector<1xf32> to vector<1x1x1xf32>
    %14 = vector.extract %13[0, 0, 0] : f32 from vector<1x1x1xf32>
    %15 = arith.addf %5, %14 : f32
    %c0_7 = arith.constant 0 : index
    %16 = memref.load %arg5[%c0_7] : memref<3xf32, #tpu.memory_space<smem>>
    memref.store %15, %arg5[%c0_7] : memref<3xf32, #tpu.memory_space<smem>>
    %c1 = arith.constant 1 : index
    %17 = memref.load %arg5[%c1] : memref<3xf32, #tpu.memory_space<smem>>
    %c0_8 = arith.constant 0 : index
    %c0_9 = arith.constant 0 : index
    %18 = vector.load %arg2[%c0_8, %c0_9] : memref<32x8xf32, #tpu.memory_space<vmem>>, vector<32x8xf32>
    %19 = arith.subf %18, %3 : vector<32x8xf32>
    %20 = math.absf %19 : vector<32x8xf32>
    %21 = vector.broadcast %4 : vector<32x1xf32> to vector<32x8xf32>
    %22 = arith.mulf %20, %21 : vector<32x8xf32>
    %23 = vector.shape_cast %22 : vector<32x8xf32> to vector<1x32x8xf32>
    %cst_10 = arith.constant dense<0.000000e+00> : vector<1xf32>
    %24 = vector.multi_reduction <add>, %23, %cst_10 [1, 2] : vector<1x32x8xf32> to vector<1xf32>
    %25 = vector.shape_cast %24 : vector<1xf32> to vector<1x1x1xf32>
    %26 = vector.extract %25[0, 0, 0] : f32 from vector<1x1x1xf32>
    %27 = arith.addf %17, %26 : f32
    %c1_11 = arith.constant 1 : index
    %28 = memref.load %arg5[%c1_11] : memref<3xf32, #tpu.memory_space<smem>>
    memref.store %27, %arg5[%c1_11] : memref<3xf32, #tpu.memory_space<smem>>
    %c2 = arith.constant 2 : index
    %29 = memref.load %arg5[%c2] : memref<3xf32, #tpu.memory_space<smem>>
    %30 = vector.shape_cast %4 : vector<32x1xf32> to vector<1x32x1xf32>
    %cst_12 = arith.constant dense<0.000000e+00> : vector<1xf32>
    %31 = vector.multi_reduction <add>, %30, %cst_12 [1, 2] : vector<1x32x1xf32> to vector<1xf32>
    %32 = vector.shape_cast %31 : vector<1xf32> to vector<1x1x1xf32>
    %33 = vector.extract %32[0, 0, 0] : f32 from vector<1x1x1xf32>
    %34 = arith.addf %29, %33 : f32
    %c2_13 = arith.constant 2 : index
    %35 = memref.load %arg5[%c2_13] : memref<3xf32, #tpu.memory_space<smem>>
    memref.store %34, %arg5[%c2_13] : memref<3xf32, #tpu.memory_space<smem>>
    return
  }
  func.func @transform_0(%arg0: i32) -> (i32, i32) {
    %c0_i32 = arith.constant 0 : i32
    %c0_i32_0 = arith.constant 0 : i32
    return %arg0, %c0_i32 : i32, i32
  }
  func.func @transform_1(%arg0: i32) -> (i32, i32) {
    %c0_i32 = arith.constant 0 : i32
    %c0_i32_0 = arith.constant 0 : i32
    return %arg0, %c0_i32 : i32, i32
  }
  func.func @transform_2(%arg0: i32) -> (i32, i32) {
    %c0_i32 = arith.constant 0 : i32
    %c0_i32_0 = arith.constant 0 : i32
    return %arg0, %c0_i32 : i32, i32
  }
  func.func @transform_3(%arg0: i32) -> (i32, i32) {
    %c0_i32 = arith.constant 0 : i32
    %c0_i32_0 = arith.constant 0 : i32
    return %arg0, %c0_i32 : i32, i32
  }
  func.func @transform_4(%arg0: i32) -> i32 {
    %c0_i32 = arith.constant 0 : i32
    %c0_i32_0 = arith.constant 0 : i32
    return %c0_i32 : i32
  }
}

module attributes {stable_mosaic.version = 11 : i64} {
  func.func @_small_losses_kernel(%arg0: memref<2x8xf32, #tpu.memory_space<vmem>>, %arg1: memref<2x8xf32, #tpu.memory_space<vmem>>, %arg2: memref<2x8xf32, #tpu.memory_space<vmem>>, %arg3: memref<2x16xf32, #tpu.memory_space<vmem>>, %arg4: memref<2x16xf32, #tpu.memory_space<vmem>>, %arg5: memref<2x16xf32, #tpu.memory_space<vmem>>, %arg6: memref<2x8xf32, #tpu.memory_space<vmem>>, %arg7: memref<2x8xf32, #tpu.memory_space<vmem>>, %arg8: memref<2x8xf32, #tpu.memory_space<vmem>>, %arg9: memref<2x32xf32, #tpu.memory_space<vmem>>, %arg10: memref<2x32xf32, #tpu.memory_space<vmem>>, %arg11: memref<7xf32, #tpu.memory_space<smem>>) attributes {dimension_semantics = [], scalar_prefetch = 0 : i64, scratch_operands = 0 : i64, tpu.core_type = #tpu.core_type<tc>} {
    %c0 = arith.constant 0 : index
    %c0_0 = arith.constant 0 : index
    %0 = vector.load %arg0[%c0, %c0_0] : memref<2x8xf32, #tpu.memory_space<vmem>>, vector<2x8xf32>
    %c0_1 = arith.constant 0 : index
    %c0_2 = arith.constant 0 : index
    %1 = vector.load %arg1[%c0_1, %c0_2] : memref<2x8xf32, #tpu.memory_space<vmem>>, vector<2x8xf32>
    %2 = arith.subf %0, %1 : vector<2x8xf32>
    %c0_3 = arith.constant 0 : index
    %c0_4 = arith.constant 0 : index
    %3 = vector.load %arg2[%c0_3, %c0_4] : memref<2x8xf32, #tpu.memory_space<vmem>>, vector<2x8xf32>
    %4 = arith.mulf %2, %2 : vector<2x8xf32>
    %5 = arith.mulf %4, %3 : vector<2x8xf32>
    %6 = vector.shape_cast %5 : vector<2x8xf32> to vector<1x2x8xf32>
    %cst = arith.constant dense<0.000000e+00> : vector<1xf32>
    %7 = vector.multi_reduction <add>, %6, %cst [1, 2] : vector<1x2x8xf32> to vector<1xf32>
    %8 = vector.shape_cast %7 : vector<1xf32> to vector<1x1x1xf32>
    %9 = vector.extract %8[0, 0, 0] : f32 from vector<1x1x1xf32>
    %10 = vector.shape_cast %3 : vector<2x8xf32> to vector<1x2x8xf32>
    %cst_5 = arith.constant dense<0.000000e+00> : vector<1xf32>
    %11 = vector.multi_reduction <add>, %10, %cst_5 [1, 2] : vector<1x2x8xf32> to vector<1xf32>
    %12 = vector.shape_cast %11 : vector<1xf32> to vector<1x1x1xf32>
    %13 = vector.extract %12[0, 0, 0] : f32 from vector<1x1x1xf32>
    %c0_6 = arith.constant 0 : index
    %14 = memref.load %arg11[%c0_6] : memref<7xf32, #tpu.memory_space<smem>>
    memref.store %9, %arg11[%c0_6] : memref<7xf32, #tpu.memory_space<smem>>
    %c1 = arith.constant 1 : index
    %15 = memref.load %arg11[%c1] : memref<7xf32, #tpu.memory_space<smem>>
    memref.store %13, %arg11[%c1] : memref<7xf32, #tpu.memory_space<smem>>
    %c0_7 = arith.constant 0 : index
    %c0_8 = arith.constant 0 : index
    %16 = vector.load %arg3[%c0_7, %c0_8] : memref<2x16xf32, #tpu.memory_space<vmem>>, vector<2x16xf32>
    %c0_9 = arith.constant 0 : index
    %c0_10 = arith.constant 0 : index
    %17 = vector.load %arg4[%c0_9, %c0_10] : memref<2x16xf32, #tpu.memory_space<vmem>>, vector<2x16xf32>
    %18 = arith.subf %16, %17 : vector<2x16xf32>
    %c0_11 = arith.constant 0 : index
    %c0_12 = arith.constant 0 : index
    %19 = vector.load %arg5[%c0_11, %c0_12] : memref<2x16xf32, #tpu.memory_space<vmem>>, vector<2x16xf32>
    %20 = arith.mulf %18, %18 : vector<2x16xf32>
    %21 = arith.mulf %20, %19 : vector<2x16xf32>
    %22 = vector.shape_cast %21 : vector<2x16xf32> to vector<1x2x16xf32>
    %cst_13 = arith.constant dense<0.000000e+00> : vector<1xf32>
    %23 = vector.multi_reduction <add>, %22, %cst_13 [1, 2] : vector<1x2x16xf32> to vector<1xf32>
    %24 = vector.shape_cast %23 : vector<1xf32> to vector<1x1x1xf32>
    %25 = vector.extract %24[0, 0, 0] : f32 from vector<1x1x1xf32>
    %26 = vector.shape_cast %19 : vector<2x16xf32> to vector<1x2x16xf32>
    %cst_14 = arith.constant dense<0.000000e+00> : vector<1xf32>
    %27 = vector.multi_reduction <add>, %26, %cst_14 [1, 2] : vector<1x2x16xf32> to vector<1xf32>
    %28 = vector.shape_cast %27 : vector<1xf32> to vector<1x1x1xf32>
    %29 = vector.extract %28[0, 0, 0] : f32 from vector<1x1x1xf32>
    %c2 = arith.constant 2 : index
    %30 = memref.load %arg11[%c2] : memref<7xf32, #tpu.memory_space<smem>>
    memref.store %25, %arg11[%c2] : memref<7xf32, #tpu.memory_space<smem>>
    %c3 = arith.constant 3 : index
    %31 = memref.load %arg11[%c3] : memref<7xf32, #tpu.memory_space<smem>>
    memref.store %29, %arg11[%c3] : memref<7xf32, #tpu.memory_space<smem>>
    %c0_15 = arith.constant 0 : index
    %c0_16 = arith.constant 0 : index
    %32 = vector.load %arg6[%c0_15, %c0_16] : memref<2x8xf32, #tpu.memory_space<vmem>>, vector<2x8xf32>
    %c0_17 = arith.constant 0 : index
    %c0_18 = arith.constant 0 : index
    %33 = vector.load %arg7[%c0_17, %c0_18] : memref<2x8xf32, #tpu.memory_space<vmem>>, vector<2x8xf32>
    %34 = arith.subf %32, %33 : vector<2x8xf32>
    %c0_19 = arith.constant 0 : index
    %c0_20 = arith.constant 0 : index
    %35 = vector.load %arg8[%c0_19, %c0_20] : memref<2x8xf32, #tpu.memory_space<vmem>>, vector<2x8xf32>
    %36 = arith.mulf %34, %34 : vector<2x8xf32>
    %37 = arith.mulf %36, %35 : vector<2x8xf32>
    %38 = vector.shape_cast %37 : vector<2x8xf32> to vector<1x2x8xf32>
    %cst_21 = arith.constant dense<0.000000e+00> : vector<1xf32>
    %39 = vector.multi_reduction <add>, %38, %cst_21 [1, 2] : vector<1x2x8xf32> to vector<1xf32>
    %40 = vector.shape_cast %39 : vector<1xf32> to vector<1x1x1xf32>
    %41 = vector.extract %40[0, 0, 0] : f32 from vector<1x1x1xf32>
    %42 = vector.shape_cast %35 : vector<2x8xf32> to vector<1x2x8xf32>
    %cst_22 = arith.constant dense<0.000000e+00> : vector<1xf32>
    %43 = vector.multi_reduction <add>, %42, %cst_22 [1, 2] : vector<1x2x8xf32> to vector<1xf32>
    %44 = vector.shape_cast %43 : vector<1xf32> to vector<1x1x1xf32>
    %45 = vector.extract %44[0, 0, 0] : f32 from vector<1x1x1xf32>
    %c4 = arith.constant 4 : index
    %46 = memref.load %arg11[%c4] : memref<7xf32, #tpu.memory_space<smem>>
    memref.store %41, %arg11[%c4] : memref<7xf32, #tpu.memory_space<smem>>
    %c5 = arith.constant 5 : index
    %47 = memref.load %arg11[%c5] : memref<7xf32, #tpu.memory_space<smem>>
    memref.store %45, %arg11[%c5] : memref<7xf32, #tpu.memory_space<smem>>
    %c0_23 = arith.constant 0 : index
    %c0_24 = arith.constant 0 : index
    %48 = vector.load %arg9[%c0_23, %c0_24] : memref<2x32xf32, #tpu.memory_space<vmem>>, vector<2x32xf32>
    %c0_25 = arith.constant 0 : index
    %c0_26 = arith.constant 0 : index
    %49 = vector.load %arg10[%c0_25, %c0_26] : memref<2x32xf32, #tpu.memory_space<vmem>>, vector<2x32xf32>
    %50 = arith.subf %48, %49 : vector<2x32xf32>
    %51 = arith.mulf %50, %50 : vector<2x32xf32>
    %52 = vector.shape_cast %51 : vector<2x32xf32> to vector<1x2x32xf32>
    %cst_27 = arith.constant dense<0.000000e+00> : vector<1xf32>
    %53 = vector.multi_reduction <add>, %52, %cst_27 [1, 2] : vector<1x2x32xf32> to vector<1xf32>
    %54 = vector.shape_cast %53 : vector<1xf32> to vector<1x1x1xf32>
    %55 = vector.extract %54[0, 0, 0] : f32 from vector<1x1x1xf32>
    %c6 = arith.constant 6 : index
    %56 = memref.load %arg11[%c6] : memref<7xf32, #tpu.memory_space<smem>>
    memref.store %55, %arg11[%c6] : memref<7xf32, #tpu.memory_space<smem>>
    return
  }
}

</mosaic_0001>

<bundles_post_ra>
// kernel: _compute_losses.2
= control target key start
LH: loop header
LB: loop body
LE: loop exit
PB: predicated region body
PF: predicated region fallthrough
CT: control target
= control target key end

     0   :  { %vm130_vm0 = vcmask 7168   ;;  %v192_v2 = vmov 0   ;;  %s282_s0 = inlined_call_operand.vmem [shape: f32[32,8], index: 0, kind: input, shape index: {}]   ;;  %s283_s1 = inlined_call_operand.vmem [shape: f32[32,8], index: 1, kind: input, shape index: {}]   ;;  %s284_s2 = inlined_call_operand.vmem [shape: f32[32,8], index: 2, kind: input, shape index: {}]   ;;  %s285_s3 = inlined_call_operand.vmem [shape: f32[32,1], index: 3, kind: input, shape index: {}]   ;;  %s286_s4 = inlined_call_operand.vmem [shape: f32[3], index: 4, kind: output, shape index: {}]  }
   0x1   :  { %v34_v0 = vld [vmem:[%s285_s3 + $0x10] sm:$0xff]  ;;  %v32_v1 = vld [vmem:[%s285_s3] sm:$0xff]  ;;  %177 = vset.pattern.permute.xlu1 %v192_v2  ;;  %176 = vset.pattern.permute.xlu0 %v192_v2  ;;  %v33_v4 = vld [vmem:[%s285_s3 + $0x8] sm:$0xff] }
   0x2   :  { %v131_v3 = vsel %vm130_vm0, %v32_v1, 0.0  ;;  %61 = vperm.xlu1 %177, %v34_v0   ;;  %51 = vperm.xlu0 %176, %v32_v1   ;;  %v132_v5 = vsel %vm130_vm0, %v33_v4, 0.0  ;;  %v35_v6 = vld [vmem:[%s285_s3 + $0x18] sm:$0xff] }
   0x3   :  { %v133_v7 = vadd.f32 %v132_v5, %v131_v3 }
   0x6   :  { %66 = vperm.xlu1 %177, %v35_v6   ;;  %56 = vperm.xlu0 %176, %v33_v4  }
   0x7   :  { %9 = vsyncpa [#allocation3], 0  ;;  %v134_v8 = vsel %vm130_vm0, %v34_v0, 0.0  ;;  %v136_v10 = vsel %vm130_vm0, %v35_v6, 0.0  ;;  %v37_v12 = vld [vmem:[%s282_s0] sm:$0xff]  ;;  %v39_v15 = vld [vmem:[%s282_s0 + $0x10] sm:$0xff] }
   0x8   :  { %v135_v9 = vadd.f32 %v134_v8, %v133_v7  ;;  %v94_v13 = vld [vmem:[%s283_s1] sm:$0xff]  ;;  %v96_v16 = vld [vmem:[%s283_s1 + $0x10] sm:$0xff]  ;;  %v38_v20 = vld [vmem:[%s282_s0 + $0x8] sm:$0xff]  ;;  %vm73_vm1 = vcmask 64512   ;;  %s156_s21 = sshll.u32 %s286_s4, 4  ;;  %s157_s21 = int_to_ptr.vmem [resolvable:$true] %s156_s21 }
   0x9   :  { %v28_v14 = vld [vmem:[%s284_s2] sm:$0xff]  ;;  %v30_v17 = vld [vmem:[%s284_s2 + $0x10] sm:$0xff]  ;;  %v95_v21 = vld [vmem:[%s283_s1 + $0x8] sm:$0xff]  ;;  %s178_s23 = scalar_lea.vmem %s157_s21, 16  ;;  %p183_p1 = scmp.lt.s32.totalorder %s157_s21, %s157_s21 }
   0xa   :  { %v137_v11 = vadd.f32 %v136_v10, %v135_v9  ;;  %v41_v18 = vsub.f32 %v37_v12, %v28_v14  ;;  %v98_v19 = vsub.f32 %v94_v13, %v28_v14  ;;  %v29_v22 = vld [vmem:[%s284_s2 + $0x8] sm:$0xff]  ;;  %v43_v23 = vsub.f32 %v39_v15, %v30_v17  ;;  %v40_v24 = vld [vmem:[%s282_s0 + $0x18] sm:$0xff]  ;;  %p179_p0 = scmp.ne.s32.totalorder %s157_s21, %s178_s23  ;;  %p184_p2 = scmp.lt.s32.totalorder %s178_s23, %s178_s23 }
   0xb   :  { %v97_v25 = vld [vmem:[%s283_s1 + $0x18] sm:$0xff]  ;;  %v100_v27 = vsub.f32 %v96_v16, %v30_v17  ;;  %v42_v28 = vsub.f32 %v38_v20, %v29_v22  ;;  %v99_v29 = vsub.f32 %v95_v21, %v29_v22 }
   0xc   :  { %v31_v26 = vld [vmem:[%s284_s2 + $0x18] sm:$0xff]  ;;  %v45_v30 = vand.u32 2147483647, %v41_v18  ;;  %v102_v31 = vand.u32 2147483647, %v98_v19  ;;  %p185_p3 = por %p184_p2, %p183_p1 }
   0xd   :  { %v44_v32 = vsub.f32 %v40_v24, %v31_v26  ;;  %v101_v33 = vsub.f32 %v97_v25, %v31_v26  ;;  %v47_v35 = vand.u32 2147483647, %v43_v23  ;;  %v104_v37 = vand.u32 2147483647, %v100_v27 }
   0xe   :  { %v46_v38 = vand.u32 2147483647, %v42_v28  ;;  %v103_v39 = vand.u32 2147483647, %v99_v29  ;;  %p186_p4 = pnand %p185_p3, %p179_p0 }
   0xf   :  { %v48_v42 = vand.u32 2147483647, %v44_v32  ;;  %v105_v43 = vand.u32 2147483647, %v101_v33 }
  0x81   :  { %v62_v34 = vpop.permute.xlu1 %61  ;;  %v52_v36 = vpop.permute.xlu0 %51 }
  0x82   :  { %v69_v40 = vmul.f32 %v52_v36, %v45_v30  ;;  %v106_v41 = vmul.f32 %v102_v31, %v52_v36  ;;  %v71_v46 = vmul.f32 %v62_v34, %v47_v35  ;;  %v108_v47 = vmul.f32 %v104_v37, %v62_v34 }
  0x84   :  { %v74_v50 = vsel %vm73_vm1, %v69_v40, 0.0  ;;  %v110_v51 = vsel %vm73_vm1, %v106_v41, 0.0  ;;  %v77_v58 = vsel %vm73_vm1, %v71_v46, 0.0  ;;  %v113_v59 = vsel %vm73_vm1, %v108_v47, 0.0 }
  0x85   :  { %v67_v44 = vpop.permute.xlu1 %66  ;;  %v57_v45 = vpop.permute.xlu0 %56 }
  0x86   :  { %v70_v48 = vmul.f32 %v57_v45, %v46_v38  ;;  %v107_v49 = vmul.f32 %v103_v39, %v57_v45  ;;  %v72_v52 = vmul.f32 %v67_v44, %v48_v42  ;;  %v109_v53 = vmul.f32 %v105_v43, %v67_v44 }
  0x88   :  { %v75_v54 = vsel %vm73_vm1, %v70_v48, 0.0  ;;  %v111_v55 = vsel %vm73_vm1, %v107_v49, 0.0  ;;  %v115_v62 = vsel %vm73_vm1, %v109_v53, 0.0  ;;  %v79_v63 = vsel %vm73_vm1, %v72_v52, 0.0 }
  0x89   :  { %v76_v56 = vadd.f32 %v75_v54, %v74_v50  ;;  %v112_v57 = vadd.f32 %v111_v55, %v110_v51 }
  0x8b   :  { %v114_v60 = vadd.f32 %v113_v59, %v112_v57  ;;  %v78_v61 = vadd.f32 %v77_v58, %v76_v56 }
  0x8d   :  { %v116_v0 = vadd.f32 %v115_v62, %v114_v60  ;;  %v80_v1 = vadd.f32 %v79_v63, %v78_v61 }
  0x8f   :  { %117 = vadd.xlane.f32.xlu1 %v116_v0  ;;  %81 = vadd.xlane.f32.xlu0 %v80_v1 }
  0x93   :  { %138 = vadd.xlane.f32.xlu0 %v137_v11 }
 0x11c   :  { %v118_v2 = vpop.xlane.xlu1 %117  ;;  %v82_v3 = vpop.xlane.xlu0 %81 }
 0x11d   :  { %v119_v4 = vrot.slane %v118_v2, 4  ;;  %v83_v5 = vrot.slane %v82_v3, 4 }
 0x11f   :  { %v120_v6 = vadd.f32 %v119_v4, %v118_v2  ;;  %v84_v7 = vadd.f32 %v83_v5, %v82_v3 }
 0x120   :  { %v139_v8 = vpop.xlane.xlu0 %138 }
 0x121   :  { %v121_v9 = vrot.slane %v120_v6, 2  ;;  %v85_v10 = vrot.slane %v84_v7, 2  ;;  %v140_v12 = vrot.slane %v139_v8, 4 }
 0x123   :  { %v122_v13 = vadd.f32 %v121_v9, %v120_v6  ;;  %v141_v14 = vadd.f32 %v140_v12, %v139_v8  ;;  %v86_v15 = vadd.f32 %v85_v10, %v84_v7 }
 0x125   :  { %v142_v16 = vrot.slane %v141_v14, 2  ;;  %v87_v17 = vrot.slane %v86_v15, 1  ;;  %v123_v18 = vrot.slane %v122_v13, 1 }
 0x127   :  { %v143_v19 = vadd.f32 %v142_v16, %v141_v14  ;;  %v88_v20 = vadd.f32 %v87_v17, %v86_v15  ;;  %v124_v21 = vadd.f32 %v123_v18, %v122_v13 }
 0x129   :  { %167 = vpush %v88_v20  ;;  %v144_v11 = vrot.slane %v143_v19, 1 }
 0x12a   :  { %169 = vpush %v124_v21 }
 0x12b   :  { %v145_v22 = vadd.f32 %v144_v11, %v143_v19 }
 0x12d   :  { %171 = vpush %v145_v22 }
 0x15a   :  { %s168_s0 = spop %167 }
 0x15b   :  { %s170_s1 = spop %169  ;;  %92 = sst [smem:[#allocation2]] %s168_s0 }
 0x15c   :  { %128 = sst [smem:[#allocation2 + $0x1]] %s170_s1 }
 0x15e   :  { %s172_s22 = spop %171 }
 0x15f   :  { %149 = sst [smem:[#allocation2 + $0x2]] %s172_s22 }
 0x160   :  { %189 = shalt.err (!%p186_p4)
}
 0x161   :  { %s193_s24 = smov [#allocation2]  }
 0x162   :  { %159 = dma.smem_to_vmem %s193_s24, 16, %s157_s21, [#allocation3]  }
 0x163   :  { %190 = dma.done.wait [#allocation3], 16  }
 0x164   :  { %191 = vsyncadd [#allocation3], 4294967280 }
 0x165   :  { %163 = sfence }
 0x166   :  { %164 = vsyncpa [#allocation3], 1 }

// kernel: _compute_losses.3
= control target key start
LH: loop header
LB: loop body
LE: loop exit
PB: predicated region body
PF: predicated region fallthrough
CT: control target
= control target key end

     0   :  { %vm76_vm0 = vcmask 123904   ;;  %vm45_vm1 = vcmask 58368   ;;  %s295_s0 = inlined_call_operand.vmem [shape: f32[2,8], index: 0, kind: input, shape index: {}]   ;;  %s296_s1 = inlined_call_operand.vmem [shape: f32[2,8], index: 1, kind: input, shape index: {}]   ;;  %s297_s2 = inlined_call_operand.vmem [shape: f32[2,8], index: 2, kind: input, shape index: {}, may-alias: {2,8}]   ;;  %s298_s3 = inlined_call_operand.vmem [shape: f32[2,16], index: 3, kind: input, shape index: {}]   ;;  %s299_s4 = inlined_call_operand.vmem [shape: f32[2,16], index: 4, kind: input, shape index: {}]   ;;  %s300_s5 = inlined_call_operand.vmem [shape: f32[2,16], index: 5, kind: input, shape index: {}]   ;;  %s301_s6 = inlined_call_operand.vmem [shape: f32[2,8], index: 6, kind: input, shape index: {}]   ;;  %s302_s7 = inlined_call_operand.vmem [shape: f32[2,8], index: 7, kind: input, shape index: {}]   ;;  %s303_s8 = inlined_call_operand.vmem [shape: f32[2,8], index: 8, kind: input, shape index: {}, may-alias: {2,8}]   ;;  %s304_s9 = inlined_call_operand.vmem [shape: f32[2,32], index: 9, kind: input, shape index: {}]   ;;  %s305_s10 = inlined_call_operand.vmem [shape: f32[2,32], index: 10, kind: input, shape index: {}]   ;;  %s306_s11 = inlined_call_operand.vmem [shape: f32[7], index: 11, kind: output, shape index: {}]  }
   0x1   :  { %v73_v0 = vld [vmem:[%s300_s5] sm:$0x3] }
   0x2   :  { %v70_v1 = vld [vmem:[%s298_s3] sm:$0x3]  ;;  %v87_v2 = vsel %vm76_vm0, %v73_v0, 0.0 }
   0x3   :  { %v71_v3 = vld [vmem:[%s299_s4] sm:$0x3]  ;;  %88 = vadd.xlane.f32.xlu1 %v87_v2 }
   0x4   :  { %v42_v4 = vld [vmem:[%s297_s2] sm:$0x3]  ;;  %v72_v5 = vsub.f32 %v70_v1, %v71_v3 }
   0x5   :  { %v56_v6 = vsel %vm45_vm1, %v42_v4, 0.0  ;;  %v39_v7 = vld [vmem:[%s295_s0] sm:$0x3] }
   0x6   :  { %v40_v8 = vld [vmem:[%s296_s1] sm:$0x3]  ;;  %57 = vadd.xlane.f32.xlu0 %v56_v6  ;;  %v74_v12 = vmul.f32 %v72_v5, %v72_v5 }
   0x7   :  { %v41_v9 = vsub.f32 %v39_v7, %v40_v8  ;;  %v101_v10 = vld [vmem:[%s301_s6] sm:$0x3] }
   0x8   :  { %v102_v11 = vld [vmem:[%s302_s7] sm:$0x3] }
   0x9   :  { %v103_v13 = vsub.f32 %v101_v10, %v102_v11  ;;  %v131_v14 = vld [vmem:[%s304_s9] sm:$0x3]  ;;  %v43_v16 = vmul.f32 %v41_v9, %v41_v9 }
   0xa   :  { %v132_v15 = vld [vmem:[%s305_s10] sm:$0x3] }
   0xb   :  { %v104_v17 = vld [vmem:[%s303_s8] sm:$0x3] }
   0xc   :  { %16 = vsyncpa [#allocation3], 0  ;;  %v75_v18 = vmul.f32 %v74_v12, %v73_v0  ;;  %v105_v19 = vmul.f32 %v103_v13, %v103_v13  ;;  %v44_v20 = vmul.f32 %v43_v16, %v42_v4  ;;  %v133_v21 = vsub.f32 %v131_v14, %v132_v15  ;;  %s154_s9 = sshll.u32 %s306_s11, 4  ;;  %s155_s9 = int_to_ptr.vmem [resolvable:$true] %s154_s9 }
   0xd   :  { %v117_v25 = vsel %vm45_vm1, %v104_v17, 0.0  ;;  %vm135_vm2 = vcmask 254976   ;;  %s178_s19 = scalar_lea.vmem %s155_s9, 16  ;;  %p183_p1 = scmp.lt.s32.totalorder %s155_s9, %s155_s9 }
   0xe   :  { %v77_v22 = vsel %vm76_vm0, %v75_v18, 0.0  ;;  %v106_v23 = vmul.f32 %v105_v19, %v104_v17  ;;  %v46_v24 = vsel %vm45_vm1, %v44_v20, 0.0  ;;  %v134_v27 = vmul.f32 %v133_v21, %v133_v21  ;;  %p179_p0 = scmp.ne.s32.totalorder %s155_s9, %s178_s19  ;;  %p184_p2 = scmp.lt.s32.totalorder %s178_s19, %s178_s19 }
   0xf   :  { %78 = vadd.xlane.f32.xlu1 %v77_v22  ;;  %47 = vadd.xlane.f32.xlu0 %v46_v24 }
  0x10   :  { %v107_v26 = vsel %vm45_vm1, %v106_v23, 0.0  ;;  %v136_v28 = vsel %vm135_vm2, %v134_v27, 0.0  ;;  %p185_p3 = por %p184_p2, %p183_p1 }
  0x12   :  { %p186_p4 = pnand %p185_p3, %p179_p0 }
  0x13   :  { %118 = vadd.xlane.f32.xlu1 %v117_v25  ;;  %108 = vadd.xlane.f32.xlu0 %v107_v26 }
  0x17   :  { %137 = vadd.xlane.f32.xlu0 %v136_v28 }
  0x90   :  { %v89_v29 = vpop.xlane.xlu1 %88 }
  0x91   :  { %v90_v31 = vrot.slane %v89_v29, 4 }
  0x93   :  { %v58_v30 = vpop.xlane.xlu0 %57  ;;  %v91_v34 = vadd.f32 %v90_v31, %v89_v29 }
  0x94   :  { %v59_v32 = vrot.slane %v58_v30, 4 }
  0x95   :  { %v92_v40 = vrot.slane %v91_v34, 2 }
  0x96   :  { %v60_v33 = vadd.f32 %v59_v32, %v58_v30 }
  0x97   :  { %v93_v52 = vadd.f32 %v92_v40, %v91_v34 }
  0x98   :  { %v61_v36 = vrot.slane %v60_v33, 2 }
  0x99   :  { %v94_v63 = vrot.slane %v93_v52, 1 }
  0x9a   :  { %v62_v47 = vadd.f32 %v61_v36, %v60_v33 }
  0x9b   :  { %v95_v8 = vadd.f32 %v94_v63, %v93_v52 }
  0x9c   :  { %v79_v35 = vpop.xlane.xlu1 %78  ;;  %v48_v38 = vpop.xlane.xlu0 %47  ;;  %v63_v57 = vrot.slane %v62_v47, 1 }
  0x9d   :  { %v80_v37 = vrot.slane %v79_v35, 4  ;;  %v49_v39 = vrot.slane %v48_v38, 4 }
  0x9e   :  { %v64_v4 = vadd.f32 %v63_v57, %v62_v47 }
  0x9f   :  { %v81_v41 = vadd.f32 %v80_v37, %v79_v35  ;;  %v50_v42 = vadd.f32 %v49_v39, %v48_v38 }
  0xa0   :  { %v119_v43 = vpop.xlane.xlu1 %118  ;;  %v109_v46 = vpop.xlane.xlu0 %108 }
  0xa1   :  { %v82_v44 = vrot.slane %v81_v41, 2  ;;  %v120_v45 = vrot.slane %v119_v43, 4  ;;  %v51_v48 = vrot.slane %v50_v42, 2  ;;  %v110_v49 = vrot.slane %v109_v46, 4 }
  0xa3   :  { %v121_v50 = vadd.f32 %v120_v45, %v119_v43  ;;  %v83_v51 = vadd.f32 %v82_v44, %v81_v41  ;;  %v111_v53 = vadd.f32 %v110_v49, %v109_v46  ;;  %v52_v54 = vadd.f32 %v51_v48, %v50_v42 }
  0xa4   :  { %v138_v56 = vpop.xlane.xlu0 %137 }
  0xa5   :  { %v122_v55 = vrot.slane %v121_v50, 2  ;;  %v84_v58 = vrot.slane %v83_v51, 1  ;;  %v112_v59 = vrot.slane %v111_v53, 2  ;;  %v139_v60 = vrot.slane %v138_v56, 4 }
  0xa6   :  { %v53_v61 = vrot.slane %v52_v54, 1 }
  0xa7   :  { %v123_v62 = vadd.f32 %v122_v55, %v121_v50  ;;  %v140_v0 = vadd.f32 %v139_v60, %v138_v56  ;;  %v85_v2 = vadd.f32 %v84_v58, %v83_v51  ;;  %v113_v3 = vadd.f32 %v112_v59, %v111_v53 }
  0xa8   :  { %v54_v1 = vadd.f32 %v53_v61, %v52_v54 }
  0xa9   :  { %v124_v5 = vrot.slane %v123_v62, 1  ;;  %v141_v6 = vrot.slane %v140_v0, 2  ;;  %v114_v7 = vrot.slane %v113_v3, 1 }
  0xaa   :  { %163 = vpush %v54_v1 }
  0xab   :  { %165 = vpush %v64_v4  ;;  %v125_v9 = vadd.f32 %v124_v5, %v123_v62  ;;  %v142_v10 = vadd.f32 %v141_v6, %v140_v0  ;;  %v115_v11 = vadd.f32 %v114_v7, %v113_v3 }
  0xac   :  { %167 = vpush %v85_v2 }
  0xad   :  { %169 = vpush %v95_v8  ;;  %v143_v12 = vrot.slane %v142_v10, 1 }
  0xae   :  { %171 = vpush %v115_v11 }
  0xaf   :  { %173 = vpush %v125_v9  ;;  %v144_v13 = vadd.f32 %v143_v12, %v142_v10 }
  0xb1   :  { %175 = vpush %v144_v13 }
  0xdb   :  { %s164_s6 = spop %163 }
  0xdc   :  { %67 = sst [smem:[#allocation2]] %s164_s6  ;;  %s166_s10 = spop %165 }
  0xdd   :  { %69 = sst [smem:[#allocation2 + $0x1]] %s166_s10  ;;  %s168_s14 = spop %167 }
  0xde   :  { %98 = sst [smem:[#allocation2 + $0x2]] %s168_s14  ;;  %s170_s15 = spop %169 }
  0xdf   :  { %100 = sst [smem:[#allocation2 + $0x3]] %s170_s15  ;;  %s172_s16 = spop %171 }
  0xe0   :  { %128 = sst [smem:[#allocation2 + $0x4]] %s172_s16  ;;  %s174_s17 = spop %173 }
  0xe1   :  { %130 = sst [smem:[#allocation2 + $0x5]] %s174_s17 }
  0xe2   :  { %s176_s18 = spop %175 }
  0xe3   :  { %147 = sst [smem:[#allocation2 + $0x6]] %s176_s18 }
  0xe4   :  { %189 = shalt.err (!%p186_p4)
}
  0xe5   :  { %s192_s11 = smov [#allocation2]  }
  0xe6   :  { %157 = dma.smem_to_vmem %s192_s11, 16, %s155_s9, [#allocation3]  }
  0xe7   :  { %190 = dma.done.wait [#allocation3], 16  }
  0xe8   :  { %191 = vsyncadd [#allocation3], 4294967280 }
  0xe9   :  { %161 = sfence }
  0xea   :  { %162 = vsyncpa [#allocation3], 1 }

</bundles_post_ra>
